<compile_context>
chip_gen: v6e
topology: v6e:2x2x1
jax: 0.10.0
libtpu: 0.0.40
codegen_flags: <defaults>
</compile_context>

<pallas_src>
import functools

import jax
import jax.numpy as jnp
from jax.experimental import pallas as pl
from jax.experimental.pallas import tpu as pltpu

D = 300  # fixed by nn.Linear(300, 300)

_VMEM_BUDGET_BYTES = 28 * 1024 * 1024   # per-step working-set budget (estimate)
_VMEM_LIMIT_BYTES = 48 * 1024 * 1024    # scoped VMEM limit handed to Mosaic


def _aligned_ques_emb_kernel(q_ref, c_ref, w_ref, b_ref, o_ref, *, approx_recip):
    # q_ref: (Bt, Lq, 300) f32   c_ref: (Bt, TLc, 300) f32
    # w_ref: (300, 384) bf16|f32 (W^T, output dim zero-padded to 384)
    # b_ref: (1, 384) f32        o_ref: (Bt, TLc, 300)
    Bt, Lq, Din = q_ref.shape
    Tc = c_ref.shape[1]
    Dp = w_ref.shape[1]

    q = q_ref[...]
    c = c_ref[...]
    w = w_ref[...]
    b = b_ref[...]

    # One shared-weight projection for [q ; ctx-tile]: a single large-M MXU
    # matmul per grid step (halves weight-streaming vs two separate dots).
    # NOTE: Lq / TLc should be multiples of 8 sublanes for free reshapes.
    x = jnp.concatenate(
        [q.reshape(Bt * Lq, Din), c.reshape(Bt * Tc, Din)], axis=0)
    h = jnp.dot(x.astype(w.dtype), w, preferred_element_type=jnp.float32)
    h = jnp.maximum(h + b, 0.0)                       # bias-add + ReLU in f32
    qd = h[:Bt * Lq].reshape(Bt, Lq, Dp)
    cd = h[Bt * Lq:].reshape(Bt, Tc, Dp)

    # ctx_dense @ query_dense^T per batch element, contracting the feature
    # axis of both operands directly (no explicit transpose / XLU relayout).
    s = jnp.einsum('bcd,bqd->bcq', cd, qd, preferred_element_type=jnp.float32)
    # TODO(synk): also cast cd/qd to bf16 here if the accuracy budget allows —
    # the logits matmul dominates FLOPs at long sequence lengths.

    # softmax over the query axis (dim=2 in the PyTorch module)
    m = jnp.max(s, axis=-1, keepdims=True)
    e = jnp.exp(s - m)
    p = e * pl.reciprocal(jnp.sum(e, axis=-1, keepdims=True), approx=approx_recip)

    # align_wts @ query_emb (kept in f32)
    o_ref[...] = jnp.einsum('bcq,bqd->bcd', p, q,
                            preferred_element_type=jnp.float32).astype(o_ref.dtype)


def _pick_tiles(B, Lq, Lc, d_in, Dp, budget_bytes):
    """Largest (Bt, TLc) whose (double-buffered) working set fits the budget.

    Prefers a single step (whole batch + whole ctx); otherwise tiles ctx on
    8-sublane multiples, then shrinks the batch tile.  The old '>= 2 grid
    steps' rule is gone: on single-TC v5e/v6e splitting the grid only adds
    per-step overhead, and on v7x the 'parallel' Lc axis still feeds both TCs.
    """
    f32, bf16 = 4, 2

    def fits(bt, tc):
        q_blk = bt * Lq * d_in * f32
        c_blk = bt * tc * d_in * f32
        o_blk = bt * tc * d_in * f32
        w_blk = d_in * Dp * bf16 + Dp * f32
        inter = (bt * (Lq + tc) * (d_in * bf16 + Dp * f32)   # concat-in + dense
                 + 3 * bt * tc * Lq * f32)                    # logits / exp / p
        return 2 * (q_blk + c_blk + o_blk) + w_blk + inter <= budget_bytes

    bt_candidates = [d for d in range(B, 0, -1) if B % d == 0]
    tc_candidates = [Lc] + list(range(((Lc - 1) // 8) * 8, 0, -8))
    for bt in bt_candidates:
        for tc in tc_candidates:
            if fits(bt, tc):
                return bt, tc
    return 1, max(1, min(Lc, 8))


def make_aligned_ques_emb(weight, bias, *, use_bf16_mxu=True,
                          vmem_budget_bytes=_VMEM_BUDGET_BYTES):
    """Prepare parameters once (W^T pad to 384 output cols + optional bf16
    cast) and return a jitted apply(query_emb, ctx_embed) -> (B, Lc, 300).

    weight: (300, 300) torch-style (out, in); bias: (300,)."""
    d_out, d_in = weight.shape
    Dp = pl.cdiv(d_out, 128) * 128                   # 300 -> 384 lane-aligned
    w_t = jnp.pad(jnp.asarray(weight, jnp.float32).T, ((0, 0), (0, Dp - d_out)))
    w_t = w_t.astype(jnp.bfloat16 if use_bf16_mxu else jnp.float32)
    b_p = jnp.pad(jnp.asarray(bias, jnp.float32), (0, Dp - d_out)).reshape(1, Dp)

    kernel = functools.partial(_aligned_ques_emb_kernel,
                               approx_recip=use_bf16_mxu)

    def apply(query_emb, ctx_embed):
        B, Lq, _ = query_emb.shape
        _, Lc, _ = ctx_embed.shape
        Bt, TLc = _pick_tiles(B, Lq, Lc, d_in, Dp, vmem_budget_bytes)
        grid = (pl.cdiv(B, Bt), pl.cdiv(Lc, TLc))
        n_lc = grid[1]

        # Advisory cost hint for XLA's scheduler around the custom call.
        proj_rows = B * (Lq * n_lc + Lc)             # qd recomputed per Lc tile
        flops = (2 * proj_rows * d_in * Dp
                 + 2 * B * Lc * Lq * Dp
                 + 2 * B * Lc * Lq * d_in)
        bytes_accessed = (4 * (B * Lq * d_in + 2 * B * Lc * d_in)
                          + w_t.dtype.itemsize * d_in * Dp + 4 * Dp)
        cost = pl.CostEstimate(flops=int(flops),
                               transcendentals=int(B * Lc * Lq),
                               bytes_accessed=int(bytes_accessed))

        return pl.pallas_call(
            kernel,
            out_shape=jax.ShapeDtypeStruct((B, Lc, d_in), query_emb.dtype),
            grid_spec=pltpu.PrefetchScalarGridSpec(
                num_scalar_prefetch=0,
                grid=grid,
                in_specs=[
                    pl.BlockSpec((Bt, Lq, d_in), lambda i, j: (i, 0, 0)),
                    pl.BlockSpec((Bt, TLc, d_in), lambda i, j: (i, j, 0)),
                    # TODO(synk): pipeline_mode=pl.Buffered(1) on W / bias would
                    # save the redundant second buffer on v7x's 64 MiB VMEM.
                    pl.BlockSpec((d_in, Dp), lambda i, j: (0, 0)),
                    pl.BlockSpec((1, Dp), lambda i, j: (0, 0)),
                ],
                out_specs=pl.BlockSpec((Bt, TLc, d_in), lambda i, j: (i, j, 0)),
            ),
            compiler_params=pltpu.CompilerParams(
                dimension_semantics=("parallel", "parallel"),
                vmem_limit_bytes=_VMEM_LIMIT_BYTES),
            cost_estimate=cost,
        )(query_emb, ctx_embed, w_t, b_p)

    return jax.jit(apply)


def aligned_ques_emb_ref(query_emb, ctx_embed, weight, bias):
    """Pure-JAX reference mirroring the PyTorch forward."""
    qd = jax.nn.relu(query_emb @ weight.T + bias)
    cd = jax.nn.relu(ctx_embed @ weight.T + bias)
    s = jnp.einsum("bcd,bqd->bcq", cd, qd)
    p = jax.nn.softmax(s, axis=2)
    return jnp.einsum("bcq,bqd->bcd", p, query_emb)


if __name__ == "__main__":
    key = jax.random.PRNGKey(0)
    k_q, k_c, k_w, k_b = jax.random.split(key, 4)

    B, Lq, Lc = 2, 8, 16
    query_emb = jax.random.normal(k_q, (B, Lq, D), dtype=jnp.float32)
    ctx_embed = jax.random.normal(k_c, (B, Lc, D), dtype=jnp.float32)

    # Deterministic synthetic parameters for nn.Linear(300, 300)
    bound = 1.0 / (D ** 0.5)
    weight = jax.random.uniform(k_w, (D, D), jnp.float32, -bound, bound)
    bias = jax.random.uniform(k_b, (D,), jnp.float32, -bound, bound)

    ref = aligned_ques_emb_ref(query_emb, ctx_embed, weight, bias)

    # Exact mode (f32 MXU, exact reciprocal): structural check at 1e-4.
    fwd_exact = make_aligned_ques_emb(weight, bias, use_bf16_mxu=False)
    out_exact = jax.block_until_ready(fwd_exact(query_emb, ctx_embed))
    assert out_exact.shape == (B, Lc, D)
    assert jnp.allclose(out_exact, ref, atol=1e-4, rtol=1e-4), \
        f"exact-mode mismatch: {jnp.max(jnp.abs(out_exact - ref))}"

    # Default fast mode (bf16 MXU operands + approx reciprocal): tolerance is
    # relaxed accordingly vs the f32 reference.
    fwd = make_aligned_ques_emb(weight, bias)
    out = jax.block_until_ready(fwd(query_emb, ctx_embed))
    assert out.shape == (B, Lc, D)
    assert jnp.allclose(out, ref, atol=5e-2, rtol=5e-2), \
        f"bf16-mode mismatch: {jnp.max(jnp.abs(out - ref))}"

    print("KERNEL_OK")
</pallas_src>

<mosaic_0001>
module attributes {stable_mosaic.version = 11 : i64} {
  func.func @_aligned_ques_emb_kernel(%arg0: i32, %arg1: i32, %arg2: memref<2x8x300xf32, #tpu.memory_space<vmem>>, %arg3: memref<2x16x300xf32, #tpu.memory_space<vmem>>, %arg4: memref<300x384xf32, #tpu.memory_space<vmem>>, %arg5: memref<1x384xf32, #tpu.memory_space<vmem>>, %arg6: memref<2x16x300xf32, #tpu.memory_space<vmem>>) attributes {dimension_semantics = [#tpu.dimension_semantics<parallel>, #tpu.dimension_semantics<parallel>], iteration_bounds = array<i64: 1, 1>, scalar_prefetch = 0 : i64, scratch_operands = 0 : i64, tpu.core_type = #tpu.core_type<tc>, window_params = [{transform_indices = @transform_0, window_bounds = array<i64: 2, 8, 300>}, {transform_indices = @transform_1, window_bounds = array<i64: 2, 16, 300>}, {pipeline_mode = #tpu.pipeline_mode<synchronous>, transform_indices = @transform_2, window_bounds = array<i64: 300, 384>}, {pipeline_mode = #tpu.pipeline_mode<synchronous>, transform_indices = @transform_3, window_bounds = array<i64: 1, 384>}, {transform_indices = @transform_4, window_bounds = array<i64: 2, 16, 300>}]} {
    %c0 = arith.constant 0 : index
    %c0_0 = arith.constant 0 : index
    %c0_1 = arith.constant 0 : index
    %0 = vector.load %arg2[%c0, %c0_0, %c0_1] : memref<2x8x300xf32, #tpu.memory_space<vmem>>, vector<2x8x300xf32>
    %c0_2 = arith.constant 0 : index
    %c0_3 = arith.constant 0 : index
    %c0_4 = arith.constant 0 : index
    %1 = vector.load %arg3[%c0_2, %c0_3, %c0_4] : memref<2x16x300xf32, #tpu.memory_space<vmem>>, vector<2x16x300xf32>
    %c0_5 = arith.constant 0 : index
    %c0_6 = arith.constant 0 : index
    %2 = vector.load %arg4[%c0_5, %c0_6] : memref<300x384xf32, #tpu.memory_space<vmem>>, vector<300x384xf32>
    %c0_7 = arith.constant 0 : index
    %c0_8 = arith.constant 0 : index
    %3 = vector.load %arg5[%c0_7, %c0_8] : memref<1x384xf32, #tpu.memory_space<vmem>>, vector<1x384xf32>
    %4 = vector.shape_cast %0 : vector<2x8x300xf32> to vector<16x300xf32>
    %5 = vector.shape_cast %1 : vector<2x16x300xf32> to vector<32x300xf32>
    %6 = tpu.concatenate %4, %5 in 0 : vector<16x300xf32>, vector<32x300xf32> -> vector<48x300xf32>
    %cst = arith.constant dense<0.000000e+00> : vector<48x384xf32>
    %7 = tpu.matmul %6, %2, %cst {dimension_numbers = #tpu.dot_dimension_numbers<[1], [0], [0], [1], [0, 0, 1, 1], [], []>} : vector<48x300xf32>, vector<300x384xf32>, vector<48x384xf32> -> vector<48x384xf32>
    %8 = vector.broadcast %3 : vector<1x384xf32> to vector<48x384xf32>
    %9 = arith.addf %7, %8 : vector<48x384xf32>
    %cst_9 = arith.constant 0.000000e+00 : f32
    %10 = vector.broadcast %cst_9 : f32 to vector<48x384xf32>
    %11 = arith.maximumf %9, %10 : vector<48x384xf32>
    %12 = vector.extract_strided_slice %11 {offsets = [0, 0], sizes = [16, 384], strides = [1, 1]} : vector<48x384xf32> to vector<16x384xf32>
    %13 = vector.shape_cast %12 : vector<16x384xf32> to vector<2x8x384xf32>
    %14 = vector.extract_strided_slice %11 {offsets = [16, 0], sizes = [32, 384], strides = [1, 1]} : vector<48x384xf32> to vector<32x384xf32>
    %15 = vector.shape_cast %14 : vector<32x384xf32> to vector<2x16x384xf32>
    "tpu.trace_start"() <{level = 10 : i32, message = "bcd,bqd->bcq"}> : () -> ()
    %cst_10 = arith.constant dense<0.000000e+00> : vector<2x16x8xf32>
    %16 = tpu.matmul %15, %13, %cst_10 {dimension_numbers = #tpu.dot_dimension_numbers<[2], [2], [1], [1], [0, 0, 0, 1, 1, 1], [0], [0]>} : vector<2x16x384xf32>, vector<2x8x384xf32>, vector<2x16x8xf32> -> vector<2x16x8xf32>
    "tpu.trace_stop"() : () -> ()
    %cst_11 = arith.constant dense<0xFF800000> : vector<2x16xf32>
    %17 = vector.multi_reduction <maximumf>, %16, %cst_11 [2] : vector<2x16x8xf32> to vector<2x16xf32>
    %18 = vector.shape_cast %17 : vector<2x16xf32> to vector<2x16x1xf32>
    %19 = vector.broadcast %18 : vector<2x16x1xf32> to vector<2x16x8xf32>
    %20 = arith.subf %16, %19 : vector<2x16x8xf32>
    %21 = math.exp %20 : vector<2x16x8xf32>
    %cst_12 = arith.constant dense<0.000000e+00> : vector<2x16xf32>
    %22 = vector.multi_reduction <add>, %21, %cst_12 [2] : vector<2x16x8xf32> to vector<2x16xf32>
    %23 = vector.shape_cast %22 : vector<2x16xf32> to vector<2x16x1xf32>
    %24 = tpu.reciprocal %23 : vector<2x16x1xf32> -> vector<2x16x1xf32>
    %25 = vector.broadcast %24 : vector<2x16x1xf32> to vector<2x16x8xf32>
    %26 = arith.mulf %21, %25 : vector<2x16x8xf32>
    "tpu.trace_start"() <{level = 10 : i32, message = "bcq,bqd->bcd"}> : () -> ()
    %cst_13 = arith.constant dense<0.000000e+00> : vector<2x16x300xf32>
    %27 = tpu.matmul %26, %0, %cst_13 {dimension_numbers = #tpu.dot_dimension_numbers<[2], [1], [1], [2], [0, 0, 0, 1, 1, 2], [0], [0]>} : vector<2x16x8xf32>, vector<2x8x300xf32>, vector<2x16x300xf32> -> vector<2x16x300xf32>
    "tpu.trace_stop"() : () -> ()
    %c0_14 = arith.constant 0 : index
    %c0_15 = arith.constant 0 : index
    %c0_16 = arith.constant 0 : index
    %28 = vector.load %arg6[%c0_14, %c0_15, %c0_16] : memref<2x16x300xf32, #tpu.memory_space<vmem>>, vector<2x16x300xf32>
    tpu.vector_store %arg6[%c0_14, %c0_15, %c0_16], %27 {strides = array<i32>} : memref<2x16x300xf32, #tpu.memory_space<vmem>>, vector<2x16x300xf32>,
    return
  }
  func.func @transform_0(%arg0: i32, %arg1: i32) -> (i32, i32, i32) {
    %c0_i32 = arith.constant 0 : i32
    %c0_i32_0 = arith.constant 0 : i32
    %c0_i32_1 = arith.constant 0 : i32
    return %arg0, %c0_i32, %c0_i32_0 : i32, i32, i32
  }
  func.func @transform_1(%arg0: i32, %arg1: i32) -> (i32, i32, i32) {
    %c0_i32 = arith.constant 0 : i32
    %c0_i32_0 = arith.constant 0 : i32
    return %arg0, %arg1, %c0_i32 : i32, i32, i32
  }
  func.func @transform_2(%arg0: i32, %arg1: i32) -> (i32, i32) {
    %c0_i32 = arith.constant 0 : i32
    %c0_i32_0 = arith.constant 0 : i32
    %c0_i32_1 = arith.constant 0 : i32
    return %c0_i32, %c0_i32_0 : i32, i32
  }
  func.func @transform_3(%arg0: i32, %arg1: i32) -> (i32, i32) {
    %c0_i32 = arith.constant 0 : i32
    %c0_i32_0 = arith.constant 0 : i32
    %c0_i32_1 = arith.constant 0 : i32
    return %c0_i32, %c0_i32_0 : i32, i32
  }
  func.func @transform_4(%arg0: i32, %arg1: i32) -> (i32, i32, i32) {
    %c0_i32 = arith.constant 0 : i32
    %c0_i32_0 = arith.constant 0 : i32
    return %arg0, %arg1, %c0_i32 : i32, i32, i32
  }
}

</mosaic_0001>

<bundles_post_ra>
// kernel: apply.1
= control target key start
LH: loop header
LB: loop body
LE: loop exit
PB: predicated region body
PF: predicated region fallthrough
CT: control target
= control target key end

     0   :  { %9 = vsyncpa [#allocation3], 0  ;;  %s1785_s0 = inlined_call_operand.hbm [shape: f32[2,8,300], index: 0, kind: input, shape index: {}]   ;;  %s1786_s1 = inlined_call_operand.hbm [shape: f32[2,16,300], index: 1, kind: input, shape index: {}]   ;;  %s1787_s2 = inlined_call_operand.hbm [shape: f32[300,384], index: 2, kind: input, shape index: {}]   ;;  %s1788_s3 = inlined_call_operand.vmem [shape: f32[1,384], index: 3, kind: input, shape index: {}]   ;;  %s1789_s4 = inlined_call_operand.hbm [shape: f32[2,16,300], index: 4, kind: output, shape index: {}]  }
   0x1   :  { %10 = vsyncpa [#allocation6], 0 }
   0x2   :  { %11 = vsyncpa [#allocation4], 0  ;;  %s1585_s15 = smov [#allocation5]   ;;  %s1586_s17 = smov [#allocation2]  }
   0x3   :  { %s29_s16 = sshll.u32 %s1585_s15, 4  ;;  %s17_s18 = sshll.u32 %s1586_s17, 4  ;;  %s30_s16 = int_to_ptr.vmem [resolvable:$true] %s29_s16  ;;  %s18_s18 = int_to_ptr.vmem [resolvable:$true] %s17_s18 }
   0x4   :  { %s1507_s19 = scalar_lea.vmem %s30_s16, 1536  ;;  %p1512_p1 = scmp.lt.s32.totalorder %s30_s16, %s30_s16 }
   0x5   :  { %p1508_p0 = scmp.ne.s32.totalorder %s30_s16, %s1507_s19  ;;  %p1513_p2 = scmp.lt.s32.totalorder %s1507_s19, %s1507_s19 }
   0x7   :  { %p1514_p3 = por %p1513_p2, %p1512_p1 }
   0x9   :  { %p1515_p4 = pnand %p1514_p3, %p1508_p0 }
   0xb   :  { %1518 = shalt.err (!%p1515_p4)
}
   0xc   :  { %s1587_s20 = smov 384   ;;  %s1588_s21 = smov 24  }
   0xd   :  { %35 = dma.hbm_to_vmem [thread:$0]  %s1786_s1, 1536, %s30_s16, [#allocation6], %s1587_s20, %s1587_s20, %s1588_s21  }
   0xe   :  { %s1527_s24 = scalar_lea.vmem %s18_s18, 768  ;;  %p1532_p6 = scmp.lt.s32.totalorder %s18_s18, %s18_s18 }
   0xf   :  { %p1528_p5 = scmp.ne.s32.totalorder %s18_s18, %s1527_s24  ;;  %p1533_p7 = scmp.lt.s32.totalorder %s1527_s24, %s1527_s24 }
  0x11   :  { %p1534_p8 = por %p1533_p7, %p1532_p6 }
  0x13   :  { %p1535_p9 = pnand %p1534_p8, %p1528_p5 }
  0x15   :  { %1538 = shalt.err (!%p1535_p9)
}
  0x16   :  { %23 = dma.hbm_to_vmem [thread:$0]  %s1785_s0, 768, %s18_s18, [#allocation3], %s1587_s20, %s1587_s20, %s1588_s21  }
  0x17   :  { %s1589_s27 = smov [#allocation7]  }
  0x18   :  { %s41_s28 = sshll.u32 %s1589_s27, 4  ;;  %s42_s28 = int_to_ptr.vmem [resolvable:$true] %s41_s28 }
  0x19   :  { %s1547_s29 = scalar_lea.vmem %s42_s28, 14592  ;;  %p1552_p11 = scmp.lt.s32.totalorder %s42_s28, %s42_s28 }
  0x1a   :  { %p1548_p10 = scmp.ne.s32.totalorder %s42_s28, %s1547_s29  ;;  %p1553_p12 = scmp.lt.s32.totalorder %s1547_s29, %s1547_s29 }
  0x1c   :  { %p1554_p13 = por %p1553_p12, %p1552_p11 }
  0x1e   :  { %p1555_p0 = pnand %p1554_p13, %p1548_p10 }
  0x20   :  { %1558 = shalt.err (!%p1555_p0)
}
  0x21   :  { %47 = dma.hbm_to_vmem [thread:$0]  %s1787_s2, 14592, %s42_s28, [#allocation6], %s1587_s20, %s1587_s20, %s1588_s21  }
  0x22   :  { %1579 = dma.done.wait [#allocation3], 768  }
  0x23   :  { %1580 = vsyncadd [#allocation3], 4294966528 }
  0x24   :  { %1581 = dma.done.wait [#allocation6], 16128  }
  0x25   :  { %1582 = vsyncadd [#allocation6], 4294951168  ;;  %v1590_v0 = vmov 0.0   ;;  %vm227_vm0 = vcmask 1043456   ;;  %v123_v1 = vld [vmem:[#allocation7 + $0x170] sm:$0xff]  ;;  %v122_v3 = vld [vmem:[#allocation7 + $0x168] sm:$0xff] }
  0x26   :  { %402 = vmatprep.mubr.f32.mxu1 %v1590_v0  ;;  %v189_v2 = vld [vmem:[#allocation7 + $0x380] sm:$0xf]  ;;  %237 = vmatprep.subr.mxu0 %v123_v1  ;;  %v188_v4 = vld [vmem:[#allocation7 + $0x378] sm:$0xf]  ;;  %v186_v6 = vld [vmem:[#allocation7 + $0x368] sm:$0xff]  ;;  %vm208_vm1 = vcmask 359424  }
  0x27   :  { %1338 = vmatprep.subr.msk.mxu1 %vm227_vm0, %v189_v2  ;;  %v120_v5 = vld [vmem:[#allocation7 + $0x158] sm:$0xff]  ;;  %238 = vmatpush1.msra.mxu0 %v122_v3  ;;  %v119_v7 = vld [vmem:[#allocation7 + $0x150] sm:$0xff]  ;;  %v185_v8 = vld [vmem:[#allocation7 + $0x360] sm:$0xff]  ;;  %vm947_vm2 = vcmask 64512  }
  0x28   :  { %1339 = vmatpush1.msk.msra.mxu1 %vm227_vm0, %v188_v4  ;;  %v117_v9 = vld [vmem:[#allocation7 + $0x140] sm:$0xff]  ;;  %239 = vmatprep.subr.mxu0 %v120_v5  ;;  %v183_v10 = vld [vmem:[#allocation7 + $0x350] sm:$0xff]  ;;  %v116_v11 = vld [vmem:[#allocation7 + $0x138] sm:$0xff] }
  0x29   :  { %360 = vmatprep.subr.mxu1 %v186_v6  ;;  %v182_v12 = vld [vmem:[#allocation7 + $0x348] sm:$0xff]  ;;  %240 = vmatpush1.msra.mxu0 %v119_v7  ;;  %v180_v14 = vld [vmem:[#allocation7 + $0x338] sm:$0xff]  ;;  %v113_v15 = vld [vmem:[#allocation7 + $0x120] sm:$0xff] }
  0x2a   :  { %361 = vmatpush1.msra.mxu1 %v185_v8  ;;  %v114_v13 = vld [vmem:[#allocation7 + $0x128] sm:$0xff]  ;;  %241 = vmatprep.subr.mxu0 %v117_v9  ;;  %v179_v16 = vld [vmem:[#allocation7 + $0x330] sm:$0xff]  ;;  %v177_v18 = vld [vmem:[#allocation7 + $0x320] sm:$0xff] }
  0x2b   :  { %362 = vmatprep.subr.mxu1 %v183_v10  ;;  %242 = vmatpush1.msra.mxu0 %v116_v11  ;;  %v111_v17 = vld [vmem:[#allocation7 + $0x110] sm:$0xff]  ;;  %v110_v19 = vld [vmem:[#allocation7 + $0x108] sm:$0xff]  ;;  %v176_v20 = vld [vmem:[#allocation7 + $0x318] sm:$0xff] }
  0x2c   :  { %363 = vmatpush1.msra.mxu1 %v182_v12  ;;  %243 = vmatprep.subr.mxu0 %v114_v13  ;;  %v108_v21 = vld [vmem:[#allocation7 + $0xf8] sm:$0xff]  ;;  %v174_v22 = vld [vmem:[#allocation7 + $0x308] sm:$0xff]  ;;  %v107_v23 = vld [vmem:[#allocation7 + $0xf0] sm:$0xff] }
  0x2d   :  { %364 = vmatprep.subr.mxu1 %v180_v14  ;;  %244 = vmatpush1.msra.mxu0 %v113_v15  ;;  %v173_v24 = vld [vmem:[#allocation7 + $0x300] sm:$0xff]  ;;  %v172_v27 = vld [vmem:[#allocation7 + $0x2f8] sm:$0xff]  ;;  %v102_v30 = vld [vmem:[#allocation7 + $0xc8] sm:$0xff] }
  0x2e   :  { %365 = vmatpush1.msra.mxu1 %v179_v16  ;;  %245 = vmatprep.subr.mxu0 %v111_v17  ;;  %v105_v25 = vld [vmem:[#allocation7 + $0xe0] sm:$0xff]  ;;  %v104_v28 = vld [vmem:[#allocation7 + $0xd8] sm:$0xff]  ;;  %v99_v34 = vld [vmem:[#allocation7 + $0xb0] sm:$0xff] }
  0x2f   :  { %366 = vmatprep.subr.mxu1 %v177_v18  ;;  %246 = vmatpush1.msra.mxu0 %v110_v19  ;;  %v1638_v26 = vld [vmem:[#allocation2 + $0x10] sm:$0xff]  ;;  %v124_v29 = vld [vmem:[#allocation7 + $0x178] sm:$0xff]  ;;  %v166_v35 = vld [vmem:[#allocation7 + $0x2c8] sm:$0xff] }
  0x30   :  { %367 = vmatpush1.msra.mxu1 %v176_v20  ;;  %247 = vmatprep.subr.mxu0 %v108_v21  ;;  %v169_v31 = vld [vmem:[#allocation7 + $0x2e0] sm:$0xff]  ;;  %v98_v36 = vld [vmem:[#allocation7 + $0xa8] sm:$0xff]  ;;  %v96_v38 = vld [vmem:[#allocation7 + $0x98] sm:$0xff] }
  0x31   :  { %368 = vmatprep.subr.mxu1 %v174_v22  ;;  %248 = vmatpush1.msra.mxu0 %v107_v23  ;;  %v101_v32 = vld [vmem:[#allocation7 + $0xc0] sm:$0xff]  ;;  %v118_v37 = vld [vmem:[#allocation7 + $0x148] sm:$0xff]  ;;  %v163_v39 = vld [vmem:[#allocation7 + $0x2b0] sm:$0xff] }
  0x32   :  { %369 = vmatpush1.msra.mxu1 %v173_v24  ;;  %249 = vmatprep.subr.mxu0 %v105_v25  ;;  %v121_v33 = vld [vmem:[#allocation7 + $0x160] sm:$0xff]  ;;  %v95_v40 = vld [vmem:[#allocation7 + $0x90] sm:$0xff]  ;;  %v160_v43 = vld [vmem:[#allocation7 + $0x298] sm:$0xff] }
  0x33   :  { %1340 = vmatmul.mubr.msk.f32.vlgmr.msra.gmra.mxu1 %vm208_vm1, %v1638_v26  ;;  %1361 = vmatprep.subr.mxu1 %v172_v27  ;;  %v115_v41 = vld [vmem:[#allocation7 + $0x130] sm:$0xff]  ;;  %v93_v42 = vld [vmem:[#allocation7 + $0x80] sm:$0xff]  ;;  %v92_v44 = vld [vmem:[#allocation7 + $0x78] sm:$0xff] }
  0x34   :  { %250 = vmatpush1.msra.mxu0 %v104_v28  ;;  %1362 = vmatpush3.msra.mxu1 %v124_v29  ;;  %v112_v45 = vld [vmem:[#allocation7 + $0x118] sm:$0xff]  ;;  %v90_v46 = vld [vmem:[#allocation7 + $0x68] sm:$0xff]  ;;  %v157_v48 = vld [vmem:[#allocation7 + $0x280] sm:$0xff] }
  0x35   :  { %251 = vmatprep.subr.mxu0 %v102_v30  ;;  %1363 = vmatprep.subr.mxu1 %v169_v31  ;;  %v1642_v47 = vld [vmem:[#allocation2 + $0x28] sm:$0xff]  ;;  %v89_v49 = vld [vmem:[#allocation7 + $0x60] sm:$0xff]  ;;  %v87_v51 = vld [vmem:[#allocation7 + $0x50] sm:$0xff] }
  0x36   :  { %252 = vmatpush1.msra.mxu0 %v101_v32  ;;  %1364 = vmatpush3.msra.mxu1 %v121_v33  ;;  %v109_v50 = vld [vmem:[#allocation7 + $0x100] sm:$0xff]  ;;  %v154_v52 = vld [vmem:[#allocation7 + $0x268] sm:$0xff]  ;;  %v84_v55 = vld [vmem:[#allocation7 + $0x38] sm:$0xff] }
  0x37   :  { %253 = vmatprep.subr.mxu0 %v99_v34  ;;  %1365 = vmatprep.subr.mxu1 %v166_v35  ;;  %v86_v53 = vld [vmem:[#allocation7 + $0x48] sm:$0xff]  ;;  %v1647_v56 = vld [vmem:[#allocation5 + $0x10] sm:$0xff]  ;;  %v81_v60 = vld [vmem:[#allocation7 + $0x20] sm:$0xff] }
  0x38   :  { %254 = vmatpush1.msra.mxu0 %v98_v36  ;;  %1366 = vmatpush3.msra.mxu1 %v118_v37  ;;  %v106_v54 = vld [vmem:[#allocation7 + $0xe8] sm:$0xff]  ;;  %v151_v57 = vld [vmem:[#allocation7 + $0x250] sm:$0xff]  ;;  %v148_v61 = vld [vmem:[#allocation7 + $0x238] sm:$0xff] }
  0x39   :  { %255 = vmatprep.subr.mxu0 %v96_v38  ;;  %1367 = vmatprep.subr.mxu1 %v163_v39  ;;  %v83_v58 = vld [vmem:[#allocation7 + $0x30] sm:$0xff]  ;;  %v80_v62 = vld [vmem:[#allocation7 + $0x18] sm:$0xff]  ;;  %v78_v1 = vld [vmem:[#allocation7 + $0x8] sm:$0xff] }
  0x3a   :  { %256 = vmatpush1.msra.mxu0 %v95_v40  ;;  %1368 = vmatpush3.msra.mxu1 %v115_v41  ;;  %v103_v59 = vld [vmem:[#allocation7 + $0xd0] sm:$0xff]  ;;  %v100_v63 = vld [vmem:[#allocation7 + $0xb8] sm:$0xff]  ;;  %v1652_v2 = vld [vmem:[#allocation5 + $0x28] sm:$0xff] }
  0x3b   :  { %257 = vmatprep.subr.mxu0 %v93_v42  ;;  %1369 = vmatprep.subr.mxu1 %v160_v43  ;;  %v145_v3 = vld [vmem:[#allocation7 + $0x220] sm:$0xff]  ;;  %v171_v6 = vld [vmem:[#allocation7 + $0x2f0] sm:$0xff]  ;;  %v142_v7 = vld [vmem:[#allocation7 + $0x208] sm:$0xff] }
  0x3c   :  { %258 = vmatpush1.msra.mxu0 %v92_v44  ;;  %408 = vmatprep.mubr.f32.mxu1 %v1590_v0  ;;  %v77_v4 = vld [vmem:[#allocation7] sm:$0xff]  ;;  %v170_v8 = vld [vmem:[#allocation7 + $0x2e8] sm:$0xff]  ;;  %v168_v10 = vld [vmem:[#allocation7 + $0x2d8] sm:$0xff] }
  0x3d   :  { %1370 = vmatpush3.msra.mxu1 %v112_v45  ;;  %259 = vmatprep.subr.mxu0 %v90_v46  ;;  %v97_v5 = vld [vmem:[#allocation7 + $0xa0] sm:$0xff]  ;;  %v94_v9 = vld [vmem:[#allocation7 + $0x88] sm:$0xff]  ;;  %v139_v12 = vld [vmem:[#allocation7 + $0x1f0] sm:$0xff] }
  0x3e   :  { %1341 = vmatmul.mubr.msk.f32.gmra.mxu1 %vm208_vm1, %v1642_v47  ;;  %1371 = vmatprep.subr.mxu1 %v157_v48  ;;  %v1657_v11 = vld [vmem:[#allocation5 + $0x40] sm:$0xff]  ;;  %v167_v13 = vld [vmem:[#allocation7 + $0x2d0] sm:$0xff]  ;;  %v136_v16 = vld [vmem:[#allocation7 + $0x1d8] sm:$0xff] }
  0x3f   :  { %260 = vmatpush1.msra.mxu0 %v89_v49  ;;  %1372 = vmatpush3.msra.mxu1 %v109_v50  ;;  %v91_v14 = vld [vmem:[#allocation7 + $0x70] sm:$0xff]  ;;  %v165_v15 = vld [vmem:[#allocation7 + $0x2c0] sm:$0xff]  ;;  %v164_v17 = vld [vmem:[#allocation7 + $0x2b8] sm:$0xff] }
  0x40   :  { %261 = vmatprep.subr.mxu0 %v87_v51  ;;  %1373 = vmatprep.subr.mxu1 %v154_v52  ;;  %v88_v18 = vld [vmem:[#allocation7 + $0x58] sm:$0xff]  ;;  %v162_v19 = vld [vmem:[#allocation7 + $0x2a8] sm:$0xff]  ;;  %v133_v21 = vld [vmem:[#allocation7 + $0x1c0] sm:$0xff] }
  0x41   :  { %262 = vmatpush1.msra.mxu0 %v86_v53  ;;  %414 = vmatprep.mubr.f32.mxu1 %v1590_v0  ;;  %v1662_v20 = vld [vmem:[#allocation5 + $0x58] sm:$0xff]  ;;  %v161_v22 = vld [vmem:[#allocation7 + $0x2a0] sm:$0xff]  ;;  %v159_v24 = vld [vmem:[#allocation7 + $0x290] sm:$0xff] }
  0x42   :  { %1374 = vmatpush3.msra.mxu1 %v106_v54  ;;  %263 = vmatprep.subr.mxu0 %v84_v55  ;;  %v85_v23 = vld [vmem:[#allocation7 + $0x40] sm:$0xff]  ;;  %v130_v25 = vld [vmem:[#allocation7 + $0x1a8] sm:$0xff]  ;;  %v156_v29 = vld [vmem:[#allocation7 + $0x278] sm:$0xff] }
  0x43   :  { %1342 = vmatmul.mubr.msk.f32.gmra.mxu1 %vm208_vm1, %v1647_v56  ;;  %1375 = vmatprep.subr.mxu1 %v151_v57  ;;  %v158_v27 = vld [vmem:[#allocation7 + $0x288] sm:$0xff]  ;;  %v127_v30 = vld [vmem:[#allocation7 + $0x190] sm:$0xff]  ;;  %v1667_v33 = vld [vmem:[#allocation2 + $0x8] sm:$0xff] }
  0x44   :  { %264 = vmatpush1.msra.mxu0 %v83_v58  ;;  %1376 = vmatpush3.msra.mxu1 %v103_v59  ;;  %v82_v28 = vld [vmem:[#allocation7 + $0x28] sm:$0xff]  ;;  %v155_v31 = vld [vmem:[#allocation7 + $0x270] sm:$0xff]  ;;  %v153_v34 = vld [vmem:[#allocation7 + $0x260] sm:$0xff] }
  0x45   :  { %265 = vmatprep.subr.mxu0 %v81_v60  ;;  %1377 = vmatprep.subr.mxu1 %v148_v61  ;;  %v79_v32 = vld [vmem:[#allocation7 + $0x10] sm:$0xff]  ;;  %v152_v36 = vld [vmem:[#allocation7 + $0x258] sm:$0xff]  ;;  %v150_v38 = vld [vmem:[#allocation7 + $0x248] sm:$0xff] }
  0x46   :  { %266 = vmatpush1.msra.mxu0 %v80_v62  ;;  %420 = vmatprep.mubr.f32.mxu1 %v1590_v0  ;;  %v1669_v35 = vld [vmem:[#allocation2] sm:$0xff]  ;;  %v190_v39 = vld [vmem:[#allocation7 + $0x388] sm:$0xf]  ;;  %v149_v40 = vld [vmem:[#allocation7 + $0x240] sm:$0xff] }
  0x47   :  { %1378 = vmatpush3.msra.mxu1 %v100_v63  ;;  %267 = vmatprep.subr.mxu0 %v78_v1  ;;  %v1671_v37 = vld [vmem:[#allocation2 + $0x20] sm:$0xff]  ;;  %v1676_v42 = vld [vmem:[#allocation2 + $0x18] sm:$0xff]  ;;  %v144_v45 = vld [vmem:[#allocation7 + $0x218] sm:$0xff] }
  0x48   :  { %1343 = vmatmul.mubr.msk.f32.gmra.mxu1 %vm208_vm1, %v1652_v2  ;;  %1379 = vmatprep.subr.mxu1 %v145_v3  ;;  %v147_v41 = vld [vmem:[#allocation7 + $0x230] sm:$0xff]  ;;  %v146_v43 = vld [vmem:[#allocation7 + $0x228] sm:$0xff]  ;;  %v141_v49 = vld [vmem:[#allocation7 + $0x200] sm:$0xff] }
  0x49   :  { %268 = vmatpush1.msra.mxu0 %v77_v4  ;;  %1380 = vmatpush3.msra.mxu1 %v97_v5  ;;  %v1678_v44 = vld [vmem:[#allocation5 + $0x8] sm:$0xff]  ;;  %v187_v46 = vld [vmem:[#allocation7 + $0x370] sm:$0xff]  ;;  %v65_v50 = vld [vmem:[#allocation5] sm:$0xff] }
  0x4a   :  { %269 = vmatprep.subr.mxu0 %v171_v6  ;;  %1381 = vmatprep.subr.mxu1 %v142_v7  ;;  %v143_v48 = vld [vmem:[#allocation7 + $0x210] sm:$0xff]  ;;  %v140_v51 = vld [vmem:[#allocation7 + $0x1f8] sm:$0xff]  ;;  %v69_v52 = vld [vmem:[#allocation5 + $0x20] sm:$0xff] }
  0x4b   :  { %270 = vmatpush2.msra.mxu0 %v170_v8  ;;  %426 = vmatprep.mubr.f32.mxu1 %v1590_v0  ;;  %v138_v53 = vld [vmem:[#allocation7 + $0x1e8] sm:$0xff]  ;;  %v184_v54 = vld [vmem:[#allocation7 + $0x358] sm:$0xff]  ;;  %v137_v55 = vld [vmem:[#allocation7 + $0x1e0] sm:$0xff] }
  0x4c   :  { %1382 = vmatpush3.msra.mxu1 %v94_v9  ;;  %271 = vmatprep.subr.mxu0 %v168_v10  ;;  %v135_v57 = vld [vmem:[#allocation7 + $0x1d0] sm:$0xff]  ;;  %v68_v58 = vld [vmem:[#allocation5 + $0x18] sm:$0xff]  ;;  %v134_v59 = vld [vmem:[#allocation7 + $0x1c8] sm:$0xff] }
  0x4d   :  { %1344 = vmatmul.mubr.msk.f32.gmra.mxu1 %vm208_vm1, %v1657_v11  ;;  %1383 = vmatprep.subr.mxu1 %v139_v12  ;;  %v72_v60 = vld [vmem:[#allocation5 + $0x38] sm:$0xff]  ;;  %v181_v62 = vld [vmem:[#allocation7 + $0x340] sm:$0xff]  ;;  %v131_v63 = vld [vmem:[#allocation7 + $0x1b0] sm:$0xff] }
  0x4e   :  { %272 = vmatpush2.msra.mxu0 %v167_v13  ;;  %1384 = vmatpush3.msra.mxu1 %v91_v14  ;;  %v132_v61 = vld [vmem:[#allocation7 + $0x1b8] sm:$0xff]  ;;  %v129_v1 = vld [vmem:[#allocation7 + $0x1a0] sm:$0xff]  ;;  %v71_v3 = vld [vmem:[#allocation5 + $0x30] sm:$0xff] }
  0x4f   :  { %273 = vmatprep.subr.mxu0 %v165_v15  ;;  %1385 = vmatprep.subr.mxu1 %v136_v16  ;;  %v128_v4 = vld [vmem:[#allocation7 + $0x198] sm:$0xff]  ;;  %v75_v5 = vld [vmem:[#allocation5 + $0x50] sm:$0xff]  ;;  %v126_v6 = vld [vmem:[#allocation7 + $0x188] sm:$0xff] }
  0x50   :  { %274 = vmatpush2.msra.mxu0 %v164_v17  ;;  %432 = vmatprep.mubr.f32.mxu1 %v1590_v0  ;;  %v125_v7 = vld [vmem:[#allocation7 + $0x180] sm:$0xff]  ;;  %v178_v8 = vld [vmem:[#allocation7 + $0x328] sm:$0xff]  ;;  %v175_v10 = vld [vmem:[#allocation7 + $0x310] sm:$0xff] }
  0x51   :  { %1386 = vmatpush3.msra.mxu1 %v88_v18  ;;  %275 = vmatprep.subr.mxu0 %v162_v19  ;;  %v74_v9 = vld [vmem:[#allocation5 + $0x48] sm:$0xff] }
  0x52   :  { %1345 = vmatmul.mubr.msk.f32.gmra.mxu1 %vm208_vm1, %v1662_v20  ;;  %1387 = vmatprep.subr.mxu1 %v133_v21 }
  0x53   :  { %276 = vmatpush2.msra.mxu0 %v161_v22  ;;  %1388 = vmatpush3.msra.mxu1 %v85_v23 }
  0x54   :  { %277 = vmatprep.subr.mxu0 %v159_v24  ;;  %1389 = vmatprep.subr.mxu1 %v130_v25  ;;  %v193_v25 = vlaneseq }
  0x55   :  { %278 = vmatpush2.msra.mxu0 %v158_v27  ;;  %1390 = vmatpush3.msra.mxu1 %v82_v28 }
  0x56   :  { %279 = vmatprep.subr.mxu0 %v156_v29  ;;  %1391 = vmatprep.subr.mxu1 %v127_v30  ;;  %v194_v29 = vshrl.u32 %v193_v25, 7 }
  0x57   :  { %280 = vmatpush2.msra.mxu0 %v155_v31  ;;  %1392 = vmatpush3.msra.mxu1 %v79_v32 }
  0x58   :  { %503 = vmatprep.mubr.f32.mxu1 %v1667_v33  ;;  %281 = vmatprep.subr.mxu0 %v153_v34  ;;  %v195_v31 = vsub.s32 0, %v194_v29  ;;  %v199_v34 = vsub.s32 1, %v194_v29 }
  0x59   :  { %504 = vmatmul.mubr.f32.vlgmr.msra.gmra.mxu1 %v1669_v35  ;;  %282 = vmatpush2.msra.mxu0 %v152_v36 }
  0x5a   :  { %508 = vmatprep.mubr.f32.mxu1 %v1671_v37  ;;  %283 = vmatprep.subr.mxu0 %v150_v38  ;;  %v191_v38 = vld [vmem:[%s1788_s3] sm:$0x7]  ;;  %s1591_s3 = smov [#allocation8]  }
  0x5b   :  { %1435 = vmatprep.subr.msk.mxu1 %vm227_vm0, %v190_v39  ;;  %284 = vmatpush2.msra.mxu0 %v149_v40  ;;  %s1325_s5 = sshll.u32 %s1591_s3, 4  ;;  %s1326_s5 = int_to_ptr.vmem [resolvable:$true] %s1325_s5 }
  0x5c   :  { %1436 = vmatpush3.msk.msra.mxu1 %vm227_vm0, %v190_v39  ;;  %285 = vmatprep.subr.mxu0 %v147_v41  ;;  %v1722_v39 = vrot.slane %v191_v38, %v195_v31  ;;  %v203_v41 = vsub.s32 2, %v194_v29  ;;  %s1559_s6 = scalar_lea.vmem %s1326_s5, 1536  ;;  %p1564_p2 = scmp.lt.s32.totalorder %s1326_s5, %s1326_s5 }
  0x5d   :  { %509 = vmatmul.mubr.f32.gmra.mxu1 %v1676_v42  ;;  %286 = vmatpush2.msra.mxu0 %v146_v43  ;;  %v1724_v43 = vrot.slane %v191_v38, %v199_v34  ;;  %p1560_p1 = scmp.ne.s32.totalorder %s1326_s5, %s1559_s6  ;;  %p1565_p3 = scmp.lt.s32.totalorder %s1559_s6, %s1559_s6 }
  0x5e   :  { %513 = vmatprep.mubr.f32.mxu1 %v1678_v44  ;;  %287 = vmatprep.subr.mxu0 %v144_v45 }
  0x5f   :  { %1437 = vmatprep.subr.mxu1 %v187_v46  ;;  %288 = vmatpush2.msra.mxu0 %v143_v48  ;;  %p1566_p4 = por %p1565_p3, %p1564_p2 }
  0x60   :  { %1438 = vmatpush3.msra.mxu1 %v187_v46  ;;  %289 = vmatprep.subr.mxu0 %v141_v49 }
  0x61   :  { %514 = vmatmul.mubr.f32.gmra.mxu1 %v65_v50  ;;  %290 = vmatpush2.msra.mxu0 %v140_v51  ;;  %p1567_p5 = pnand %p1566_p4, %p1560_p1 }
  0x62   :  { %518 = vmatprep.mubr.f32.mxu1 %v69_v52  ;;  %291 = vmatprep.subr.mxu0 %v138_v53 }
  0x63   :  { %1439 = vmatprep.subr.mxu1 %v184_v54  ;;  %292 = vmatpush2.msra.mxu0 %v137_v55 }
  0x64   :  { %1440 = vmatpush3.msra.mxu1 %v184_v54  ;;  %293 = vmatprep.subr.mxu0 %v135_v57 }
  0x65   :  { %519 = vmatmul.mubr.f32.gmra.mxu1 %v68_v58  ;;  %294 = vmatpush2.msra.mxu0 %v134_v59 }
  0x66   :  { %523 = vmatprep.mubr.f32.mxu1 %v72_v60  ;;  %295 = vmatprep.subr.mxu0 %v132_v61 }
  0x67   :  { %1441 = vmatprep.subr.mxu1 %v181_v62  ;;  %296 = vmatpush2.msra.mxu0 %v131_v63 }
  0x68   :  { %301 = vmatprep.mubr.f32.mxu0 %v1667_v33  ;;  %297 = vmatprep.subr.mxu0 %v129_v1 }
  0x69   :  { %524 = vmatmul.mubr.f32.gmra.mxu1 %v71_v3  ;;  %298 = vmatpush2.msra.mxu0 %v128_v4 }
  0x6a   :  { %528 = vmatprep.mubr.f32.mxu1 %v75_v5  ;;  %299 = vmatprep.subr.mxu0 %v126_v6 }
  0x6b   :  { %1442 = vmatpush3.msra.mxu1 %v181_v62  ;;  %300 = vmatpush2.msra.mxu0 %v125_v7 }
  0x6c   :  { %1443 = vmatprep.subr.mxu1 %v178_v8  ;;  %302 = vmatmul.mubr.f32.vlgmr.msra.gmra.mxu0 %v1669_v35 }
  0x6d   :  { %529 = vmatmul.mubr.f32.gmra.mxu1 %v74_v9  ;;  %307 = vmatprep.mubr.f32.mxu0 %v1671_v37 }
  0x6e   :  { %1444 = vmatpush3.msra.mxu1 %v178_v8  ;;  %1447 = vmatprep.mubr.msk.f32.mxu1 %vm208_vm1, %v1638_v26 }
  0x6f   :  { %1445 = vmatprep.subr.mxu1 %v175_v10 }
  0x70   :  { %1446 = vmatpush3.msra.mxu1 %v175_v10  ;;  %308 = vmatmul.mubr.f32.gmra.mxu0 %v1676_v42 }
  0x71   :  { %1448 = vmatmul.mubr.msk.f32.vlgmr.msra.gmra.mxu1 %vm208_vm1, %v1642_v47  ;;  %313 = vmatprep.mubr.f32.mxu0 %v1678_v44 }
  0x72   :  { %1450 = vmatprep.mubr.msk.f32.mxu1 %vm208_vm1, %v1647_v56 }
  0x74   :  { %314 = vmatmul.mubr.f32.gmra.mxu0 %v65_v50 }
  0x75   :  { %1451 = vmatmul.mubr.msk.f32.gmra.mxu1 %vm208_vm1, %v1652_v2  ;;  %319 = vmatprep.mubr.f32.mxu0 %v69_v52  ;;  %v204_v52 = vrot.slane %v191_v38, %v203_v41 }
  0x76   :  { %1453 = vmatprep.mubr.msk.f32.mxu1 %vm208_vm1, %v1657_v11 }
  0x78   :  { %320 = vmatmul.mubr.f32.gmra.mxu0 %v68_v58 }
  0x79   :  { %1454 = vmatmul.mubr.msk.f32.gmra.mxu1 %vm208_vm1, %v1662_v20  ;;  %325 = vmatprep.mubr.f32.mxu0 %v72_v60 }
  0x7c   :  { %326 = vmatmul.mubr.f32.gmra.mxu0 %v71_v3 }
  0x7d   :  { %331 = vmatprep.mubr.f32.mxu0 %v75_v5 }
  0x80   :  { %332 = vmatmul.mubr.f32.gmra.mxu0 %v74_v9 }
  0xf3   :  { %v404_v12 = vpop.f32.mrf.mxu1 }
  0xf5   :  { %v406_v13 = vpop.f32.mrf.mxu1 }
  0xfe   :  { %v1701_v14 = vpop.f32.mrf.mxu1 }
 0x100   :  { %v412_v56 = vpop.f32.mrf.mxu1 }
 0x103   :  { %v1703_v15 = vpop.f32.mrf.mxu1 }
 0x105   :  { %v1705_v2 = vpop.f32.mrf.mxu1 }
 0x108   :  { %v1707_v16 = vpop.f32.mrf.mxu1 }
 0x10a   :  { %v1709_v11 = vpop.f32.mrf.mxu1 }
 0x10d   :  { %v1711_v17 = vpop.f32.mrf.mxu1 }
 0x10f   :  { %v1713_v18 = vpop.f32.mrf.mxu1 }
 0x112   :  { %v1715_v19 = vpop.f32.mrf.mxu1 }
 0x114   :  { %v1717_v20 = vpop.f32.mrf.mxu1 }
 0x119   :  { %v1393_v21 = vpop.f32.mrf.mxu1 }
 0x11b   :  { %v1394_v22 = vpop.f32.mrf.mxu1 }
 0x11c   :  { %v1395_v48 = vadd.f32 %v1394_v22, %v1393_v21 }
 0x11d   :  { %v1396_v23 = vpop.f32.mrf.mxu1 }
 0x11e   :  { %v506_v63 = vadd.f32 %v1395_v48, %v204_v52 }
 0x11f   :  { %v1397_v24 = vpop.f32.mrf.mxu1 }
 0x120   :  { %v1398_v49 = vadd.f32 %v1397_v24, %v1396_v23 }
 0x121   :  { %v1399_v27 = vpop.f32.mrf.mxu1 }
 0x122   :  { %v511_v61 = vadd.f32 %v1398_v49, %v204_v52 }
 0x123   :  { %v1400_v28 = vpop.f32.mrf.mxu1 }
 0x124   :  { %v1401_v60 = vadd.f32 %v1400_v28, %v1399_v27 }
 0x125   :  { %v1402_v30 = vpop.f32.mrf.mxu1 }
 0x126   :  { %v516_v27 = vadd.f32 %v1401_v60, %v204_v52 }
 0x127   :  { %v1403_v32 = vpop.f32.mrf.mxu1 }
 0x128   :  { %v1404_v58 = vadd.f32 %v1403_v32, %v1402_v30 }
 0x129   :  { %v1405_v36 = vpop.f32.mrf.mxu1 }
 0x12b   :  { %v1406_v40 = vpop.f32.mrf.mxu1 }
 0x12c   :  { %v303_v44 = vpop.f32.mrf.mxu0  ;;  %v1407_v23 = vadd.f32 %v1406_v40, %v1405_v36 }
 0x12d   :  { %v1408_v45 = vpop.f32.mrf.mxu1  ;;  %v304_v46 = vadd.f32 %v303_v44, %v1722_v39 }
 0x12e   :  { %v305_v50 = vpop.f32.mrf.mxu0  ;;  %v526_v49 = vadd.f32 %v1407_v23, %v204_v52 }
 0x12f   :  { %v1409_v51 = vpop.f32.mrf.mxu1  ;;  %v306_v53 = vadd.f32 %v305_v50, %v1724_v43  ;;  %v405_v54 = vadd.f32 %v404_v12, %v304_v46 }
 0x130   :  { %v309_v55 = vpop.f32.mrf.mxu0  ;;  %v1410_v6 = vadd.f32 %v1409_v51, %v1408_v45 }
 0x131   :  { %v1449_v57 = vpop.f32.mrf.mxu1  ;;  %v407_v59 = vadd.f32 %v406_v13, %v306_v53  ;;  %v629_v5 = vmax.f32 %v405_v54, 0.0  ;;  %v310_v12 = vadd.f32 %v309_v55, %v1722_v39  ;;  %v521_v13 = vadd.f32 %v1404_v58, %v204_v52 }
 0x132   :  { %v311_v62 = vpop.f32.mrf.mxu0  ;;  %v606_v7 = vadd.f32 %v1449_v57, %v511_v61  ;;  %v531_v41 = vadd.f32 %v1410_v6, %v204_v52 }
 0x133   :  { %v600_v1 = vpop.f32.mrf.mxu1  ;;  %v630_v3 = vmax.f32 %v407_v59, 0.0  ;;  %v312_v4 = vadd.f32 %v311_v62, %v1724_v43  ;;  %v411_v45 = vadd.f32 %v1701_v14, %v310_v12 }
 0x134   :  { %v601_v8 = vadd.f32 %v600_v1, %v506_v63  ;;  %v315_v9 = vpop.f32.mrf.mxu0  ;;  %v634_v32 = vmax.f32 %v606_v7, 0.0 }
 0x135   :  { %v1452_v10 = vpop.f32.mrf.mxu1  ;;  %v413_v21 = vadd.f32 %v412_v56, %v312_v4  ;;  %v316_v22 = vadd.f32 %v315_v9, %v1722_v39  ;;  %677 = vmatprep.subr.mxu1 %v630_v3  ;;  %v632_v58 = vmax.f32 %v411_v45, 0.0 }
 0x136   :  { %v631_v24 = vmax.f32 %v601_v8, 0.0  ;;  %v317_v25 = vpop.f32.mrf.mxu0  ;;  %678 = vmatpush1.xpose.msra.mxu1 %v629_v5  ;;  %v616_v30 = vadd.f32 %v1452_v10, %v521_v13 }
 0x137   :  { %v610_v28 = vpop.f32.mrf.mxu1  ;;  %v633_v29 = vmax.f32 %v413_v21, 0.0  ;;  %v318_v31 = vadd.f32 %v317_v25, %v1724_v43  ;;  %v417_v34 = vadd.f32 %v1703_v15, %v316_v22 }
 0x138   :  { %v611_v38 = vadd.f32 %v610_v28, %v516_v27  ;;  %1456 = vmatprep.subr.mxu0 %v631_v24  ;;  %v321_v56 = vpop.f32.mrf.mxu0  ;;  %v640_v51 = vmax.f32 %v616_v30, 0.0 }
 0x139   :  { %v1455_v44 = vpop.f32.mrf.mxu1  ;;  %v419_v36 = vadd.f32 %v1705_v2, %v318_v31  ;;  %v322_v40 = vadd.f32 %v321_v56, %v1722_v39  ;;  %1457 = vmatpush3.xpose.msra.mxu0 %v631_v24  ;;  %827 = vmatprep.subr.mxu1 %v633_v29  ;;  %v635_v55 = vmax.f32 %v417_v34, 0.0 }
 0x13a   :  { %v637_v46 = vmax.f32 %v611_v38, 0.0  ;;  %1461 = vmatprep.subr.mxu0 %v634_v32  ;;  %v323_v48 = vpop.f32.mrf.mxu0  ;;  %v626_v53 = vadd.f32 %v1455_v44, %v531_v41 }
 0x13b   :  { %v620_v50 = vpop.f32.mrf.mxu1  ;;  %v636_v15 = vmax.f32 %v419_v36, 0.0  ;;  %v324_v54 = vadd.f32 %v323_v48, %v1724_v43  ;;  %v423_v57 = vadd.f32 %v1707_v16, %v322_v40 }
 0x13c   :  { %v621_v14 = vadd.f32 %v620_v50, %v526_v49  ;;  %1458 = vmatprep.mubr.f32.mxu0 %v637_v46  ;;  %v327_v2 = vpop.f32.mrf.mxu0  ;;  %v646_v62 = vmax.f32 %v626_v53, 0.0 }
 0x13d   :  { %v425_v59 = vadd.f32 %v1709_v11, %v324_v54  ;;  %v328_v60 = vadd.f32 %v327_v2, %v1722_v39  ;;  %1459 = vmatmul.mubr.f32.vlgmr.msra.gmra.mxu0 %v640_v51  ;;  %711 = vmatprep.mubr.f32.mxu1 %v636_v15  ;;  %v638_v16 = vmax.f32 %v423_v57, 0.0 }
 0x13e   :  { %v643_v52 = vmax.f32 %v621_v14, 0.0  ;;  %1462 = vmatpush3.xpose.msra.mxu0 %v634_v32  ;;  %v329_v61 = vpop.f32.mrf.mxu0  ;;  %712 = vmatmul.mubr.f32.vlgmr.msra.gmra.mxu1 %v635_v55 }
 0x13f   :  { %v639_v63 = vmax.f32 %v425_v59, 0.0  ;;  %v330_v1 = vadd.f32 %v329_v61, %v1724_v43  ;;  %828 = vmatpush1.xpose.msra.mxu1 %v632_v58  ;;  %1028 = vmatprep.subr.mxu0 %v1667_v33  ;;  %v429_v3 = vadd.f32 %v1711_v17, %v328_v60 }
 0x140   :  { %1463 = vmatprep.mubr.f32.mxu0 %v643_v52  ;;  %v333_v11 = vpop.f32.mrf.mxu0  ;;  %1466 = vmatprep.subr.mxu1 %v1638_v26 }
 0x141   :  { %v431_v4 = vadd.f32 %v1713_v18, %v330_v1  ;;  %v334_v5 = vadd.f32 %v333_v11, %v1722_v39  ;;  %1464 = vmatmul.mubr.f32.vlgmr.msra.gmra.mxu0 %v646_v62  ;;  %716 = vmatprep.mubr.f32.mxu1 %v639_v63  ;;  %v641_v17 = vmax.f32 %v429_v3, 0.0 }
 0x142   :  { %v335_v6 = vpop.f32.mrf.mxu0  ;;  %717 = vmatmul.mubr.f32.gmra.mxu1 %v638_v16  ;;  %1029 = vmatpush1.msra.mxu0 %v1669_v35 }
 0x143   :  { %v642_v7 = vmax.f32 %v431_v4, 0.0  ;;  %v336_v33 = vadd.f32 %v335_v6, %v1724_v43  ;;  %1062 = vmatprep.mubr.f32.mxu0 %v1590_v0  ;;  %1471 = vmatprep.subr.mxu0 %v1642_v47  ;;  %v435_v8 = vadd.f32 %v1715_v19, %v334_v5 }
 0x145   :  { %v437_v18 = vadd.f32 %v1717_v20, %v336_v33  ;;  %861 = vmatprep.mubr.f32.mxu1 %v642_v7  ;;  %v644_v9 = vmax.f32 %v435_v8, 0.0 }
 0x146   :  { %862 = vmatmul.mubr.f32.vlgmr.msra.gmra.mxu1 %v641_v17 }
 0x147   :  { %v645_v39 = vmax.f32 %v437_v18, 0.0  ;;  %1467 = vmatpush3.msra.mxu1 %v1638_v26 }
 0x148   :  { %1186 = vmatprep.subr.mxu1 %v1671_v37 }
 0x149   :  { %866 = vmatprep.mubr.f32.mxu1 %v645_v39 }
 0x14a   :  { %867 = vmatmul.mubr.f32.gmra.mxu1 %v644_v9 }
 0x1fd   :  { %v1460_v35 = vpop.f32.mrf.mxu0 }
 0x1fe   :  { %v713_v43 = vpop.f32.mrf.mxu1 }
 0x1ff   :  { %v788_v10 = vpop.f32.mrf.mxu0 }
 0x200   :  { %v789_v12 = vadd.f32 %v788_v10, %v713_v43  ;;  %v715_v21 = vpop.f32.mrf.mxu1 }
 0x201   :  { %v1465_v22 = vpop.f32.mrf.mxu0 }
 0x202   :  { %v948_v19 = vsel %vm947_vm2, %v789_v12, -inf  ;;  %v718_v20 = vpop.f32.mrf.mxu1 }
 0x203   :  { %949 = vmax.xlane.f32.xlu0 %v948_v19  ;;  %v794_v13 = vadd.f32 %v1460_v35, %v718_v20  ;;  %v938_v24 = vpop.f32.mrf.mxu0 }
 0x204   :  { %v720_v23 = vpop.f32.mrf.mxu1 }
 0x205   :  { %v951_v26 = vsel %vm947_vm2, %v794_v13, -inf }
 0x206   :  { %v863_v25 = vpop.f32.mrf.mxu1 }
 0x207   :  { %952 = vmax.xlane.f32.xlu0 %v951_v26  ;;  %v939_v37 = vadd.f32 %v938_v24, %v863_v25 }
 0x208   :  { %v865_v27 = vpop.f32.mrf.mxu1 }
 0x209   :  { %v954_v28 = vsel %vm947_vm2, %v939_v37, -inf }
 0x20a   :  { %955 = vmax.xlane.f32.xlu1 %v954_v28  ;;  %v868_v29 = vpop.f32.mrf.mxu1 }
 0x20b   :  { %v944_v30 = vadd.f32 %v1465_v22, %v868_v29 }
 0x20c   :  { %v870_v31 = vpop.f32.mrf.mxu1 }
 0x20d   :  { %v957_v32 = vsel %vm947_vm2, %v944_v30, -inf }
 0x20e   :  { %958 = vmax.xlane.f32.xlu1 %v957_v32 }
 0x28c   :  { %v950_v34 = vpop.xlane.xlu0 %949 }
 0x28d   :  { %v960_v38 = vsub.f32 %v789_v12, %v950_v34 }
 0x28f   :  { %v964_v56 = vmul.f32 1.442695, %v960_v38 }
 0x290   :  { %v953_v41 = vpop.xlane.xlu0 %952 }
 0x291   :  { %1483 = vpow2.f32 %v964_v56  ;;  %v961_v44 = vsub.f32 %v794_v13, %v953_v41 }
 0x293   :  { %v966_v45 = vmul.f32 1.442695, %v961_v44  ;;  %v956_v36 = vpop.xlane.xlu1 %955 }
 0x294   :  { %v962_v40 = vsub.f32 %v939_v37, %v956_v36 }
 0x295   :  { %1485 = vpow2.f32 %v966_v45 }
 0x296   :  { %v968_v46 = vmul.f32 1.442695, %v962_v40 }
 0x297   :  { %v959_v48 = vpop.xlane.xlu1 %958 }
 0x298   :  { %1487 = vpow2.f32 %v968_v46  ;;  %v963_v49 = vsub.f32 %v944_v30, %v959_v48 }
 0x29a   :  { %v970_v50 = vmul.f32 1.442695, %v963_v49 }
 0x29c   :  { %1489 = vpow2.f32 %v970_v50 }
 0x29e   :  { %v1484_v51 = vpop.eup %1483 }
 0x29f   :  { %v972_v15 = vsel %vm947_vm2, %v1484_v51, 0.0 }
 0x2a0   :  { %973 = vadd.xlane.f32.xlu0 %v972_v15 }
 0x2a2   :  { %v1486_v53 = vpop.eup %1485 }
 0x2a3   :  { %v975_v54 = vsel %vm947_vm2, %v1486_v53, 0.0 }
 0x2a4   :  { %976 = vadd.xlane.f32.xlu1 %v975_v54 }
 0x2a5   :  { %v1488_v55 = vpop.eup %1487 }
 0x2a6   :  { %v978_v57 = vsel %vm947_vm2, %v1488_v55, 0.0 }
 0x2a7   :  { %979 = vadd.xlane.f32.xlu0 %v978_v57 }
 0x2a9   :  { %v1490_v14 = vpop.eup %1489 }
 0x2aa   :  { %v981_v2 = vsel %vm947_vm2, %v1490_v14, 0.0 }
 0x2ab   :  { %982 = vadd.xlane.f32.xlu1 %v981_v2 }
 0x329   :  { %v974_v58 = vpop.xlane.xlu0 %973 }
 0x32a   :  { %1491 = vrcp.f32 %v974_v58 }
 0x32d   :  { %v977_v59 = vpop.xlane.xlu1 %976 }
 0x32e   :  { %1493 = vrcp.f32 %v977_v59 }
 0x330   :  { %v980_v60 = vpop.xlane.xlu0 %979 }
 0x331   :  { %1495 = vrcp.f32 %v980_v60 }
 0x334   :  { %v983_v52 = vpop.xlane.xlu1 %982 }
 0x335   :  { %1497 = vrcp.f32 %v983_v52 }
 0x337   :  { %v1492_v61 = vpop.eup %1491 }
 0x338   :  { %v988_v62 = vmul.f32 %v1492_v61, %v1484_v51 }
 0x33a   :  { %1353 = vmatmul.mubr.msk.f32.vlgmr.msra.gmra.mxu0 %vm947_vm2, %v988_v62  ;;  %1468 = vmatprep.mubr.msk.f32.mxu1 %vm947_vm2, %v988_v62 }
 0x33b   :  { %v1494_v63 = vpop.eup %1493  ;;  %1068 = vmatprep.mubr.f32.mxu0 %v1590_v0  ;;  %1472 = vmatpush3.msra.mxu0 %v1642_v47 }
 0x33c   :  { %v989_v1 = vmul.f32 %v1494_v63, %v1486_v53 }
 0x33e   :  { %v1496_v16 = vpop.eup %1495  ;;  %1354 = vmatmul.mubr.msk.f32.gmra.mxu0 %vm947_vm2, %v989_v1  ;;  %1469 = vmatmul.mubr.msk.f32.vlgmr.msra.gmra.mxu1 %vm947_vm2, %v989_v1 }
 0x33f   :  { %1187 = vmatpush1.msra.mxu1 %v1676_v42  ;;  %1220 = vmatprep.mubr.f32.mxu1 %v1590_v0  ;;  %v990_v3 = vmul.f32 %v1496_v16, %v1488_v55 }
 0x341   :  { %1473 = vmatprep.mubr.msk.f32.mxu0 %vm947_vm2, %v990_v3 }
 0x342   :  { %v1498_v11 = vpop.eup %1497  ;;  %1357 = vmatmul.mubr.msk.f32.vlgmr.msra.gmra.mxu1 %vm947_vm2, %v990_v3 }
 0x343   :  { %1226 = vmatprep.mubr.f32.mxu1 %v1590_v0  ;;  %v991_v4 = vmul.f32 %v1498_v11, %v1490_v14 }
 0x345   :  { %1474 = vmatmul.mubr.msk.f32.vlgmr.msra.gmra.mxu0 %vm947_vm2, %v991_v4 }
 0x346   :  { %1358 = vmatmul.mubr.msk.f32.gmra.mxu1 %vm947_vm2, %v991_v4 }
 0x3fa   :  { %v1064_v47 = vpop.f32.mrf.mxu0 }
 0x3fb   :  { %1308 = vst [vmem:[#allocation8] sm:$0xff] %v1064_v47 }
 0x3fc   :  { %v1066_v5 = vpop.f32.mrf.mxu0 }
 0x3fd   :  { %1309 = vst [vmem:[#allocation8 + $0x8] sm:$0xff] %v1066_v5 }
 0x3fe   :  { %v1070_v42 = vpop.f32.mrf.mxu0  ;;  %v1470_v6 = vpop.f32.mrf.mxu1 }
 0x3ff   :  { %1311 = vst [vmem:[#allocation8 + $0x18] sm:$0xff] %v1070_v42  ;;  %1313 = vst.msk [vmem:[#allocation8 + $0x28] sm:$0xff] %vm208_vm1, %v1470_v6 }
 0x400   :  { %v1072_v7 = vpop.f32.mrf.mxu0  ;;  %v1141_v33 = vpop.f32.mrf.mxu1 }
 0x401   :  { %1312 = vst [vmem:[#allocation8 + $0x20] sm:$0xff] %v1072_v7  ;;  %1310 = vst.msk [vmem:[#allocation8 + $0x10] sm:$0xff] %vm208_vm1, %v1141_v33 }
 0x402   :  { %v1222_v0 = vpop.f32.mrf.mxu1 }
 0x403   :  { %1314 = vst [vmem:[#allocation8 + $0x30] sm:$0xff] %v1222_v0 }
 0x404   :  { %v1224_v17 = vpop.f32.mrf.mxu1 }
 0x405   :  { %1315 = vst [vmem:[#allocation8 + $0x38] sm:$0xff] %v1224_v17  ;;  %v1475_v8 = vpop.f32.mrf.mxu0 }
 0x406   :  { %v1228_v18 = vpop.f32.mrf.mxu1  ;;  %1319 = vst.msk [vmem:[#allocation8 + $0x58] sm:$0xff] %vm208_vm1, %v1475_v8 }
 0x407   :  { %1317 = vst [vmem:[#allocation8 + $0x48] sm:$0xff] %v1228_v18  ;;  %v1299_v39 = vpop.f32.mrf.mxu0 }
 0x408   :  { %v1230_v9 = vpop.f32.mrf.mxu1  ;;  %1316 = vst.msk [vmem:[#allocation8 + $0x40] sm:$0xff] %vm208_vm1, %v1299_v39 }
 0x409   :  { %1318 = vst [vmem:[#allocation8 + $0x50] sm:$0xff] %v1230_v9 }
 0x40a   :  { %1570 = shalt.err (!%p1567_p5)
}
 0x40b   :  { %1331 = dma.vmem_to_hbm [thread:$0]  %s1326_s5, 1536, %s1789_s4, [#allocation4], %s1587_s20, %s1587_s20, %s1588_s21  }
 0x40c   :  { %1583 = dma.done.wait [#allocation4], 1536  }
 0x40d   :  { %1584 = vsyncadd [#allocation4], 4294965760 }
 0x40e   :  { %1335 = vsyncpa [#allocation3], 1 }
 0x40f   :  { %1336 = vsyncpa [#allocation6], 1 }
 0x410   :  { %1337 = vsyncpa [#allocation4], 1 }

</bundles_post_ra>
